<compile_context>
chip_gen: v7x
topology: tpu7x:2x2x1
jax: 0.10.0
libtpu: 0.0.40
codegen_flags: <defaults>
</compile_context>

<pallas_src>
import functools

import jax
import jax.numpy as jnp
from jax import lax
from jax.experimental import pallas as pl
from jax.experimental.pallas import tpu as pltpu


def conv_pipe_kernel(x_ref, w1_ref, w2_ref, o_ref, *, H, W, num_images):
    """Fused conv3x3 -> ReLU -> convT3x3 -> ReLU.

    x_ref : (Cin,  N*H*W)   batch folded onto the lane axis, each image row-major
    w1_ref: (Cmid, 9*Cin)   conv1 weights, column = (ki*3+kj)*Cin + ci
    w2_ref: (Cout, 9*Cmid)  conv2 (flipped convT) weights, column = (ki*3+kj)*Cmid + c1
    o_ref : (Cout, N*H*W)
    """
    cin = x_ref.shape[0]
    cmid = w1_ref.shape[0]
    cout = w2_ref.shape[0]
    HW = H * W
    L = num_images * HW
    Ho, Wo = H - 2, W - 2                        # conv1 VALID output extent

    x = x_ref[...].astype(jnp.float32)           # (Cin, L) resident slab
    w1 = w1_ref[...].astype(jnp.float32)         # (Cmid, 9*Cin)
    w2 = w2_ref[...].astype(jnp.float32)         # (Cout, 9*Cmid)

    def shifted(a, s):
        # shifted(a, s)[:, p] == a[:, (p + s) % L]   (== jnp.roll(a, -s, axis=1)).
        k = (-s) % L                              # non-negative XLU rotate amount
        return a if k == 0 else pltpu.roll(a, k, axis=1)

    # ---------------- conv1: VALID 3x3 cross-correlation -------------------
    # y1[c, n*HW + r*W + q] = sum_{ci,ki,kj} w1[c,ci,ki,kj] * x[ci, n*HW + (r+ki)*W + (q+kj)]
    # For valid outputs (r < Ho, q < Wo) the lane shift s = ki*W + kj never crosses a
    # row or an image boundary, so those lanes are exact; the rest are zeroed below.
    # One small MXU matmul per tap does the channel contraction.
    y1 = jnp.zeros((cmid, L), jnp.float32)
    for ki in range(3):
        for kj in range(3):
            s = ki * W + kj
            base = (ki * 3 + kj) * cin
            y1 = y1 + jnp.dot(w1[:, base:base + cin], shifted(x, s),
                              preferred_element_type=jnp.float32)

    # ReLU + zero the invalid border (rows >= Ho, cols >= Wo) of each HxW grid.
    # These zeros double as the implicit ConvTranspose zero-padding below.
    p = lax.broadcasted_iota(jnp.int32, (1, L), 1)          # lane iota, broadcast over channels
    valid = jnp.logical_and(p % W < Wo, p % HW < Ho * W)
    y1 = jnp.where(valid, jnp.maximum(y1, 0.0), 0.0)

    # ---------------- conv2: ConvTranspose2d(3x3) == "full" conv ------------
    # y2[c, p] = sum_{c1,ki,kj} w2f[c,c1,ki,kj] * y1pad[c1, r+ki, q+kj] with
    # y1pad = pad(y1_valid, 2).  On the folded grid this is a lane shift by
    # t = (ki-2)*W + (kj-2) <= 0; every out-of-range tap lands on a zeroed border
    # lane (of this image, the neighbouring image, or the wrapped tail), so it
    # contributes exactly 0 -- no padded buffer, no per-tap masks.
    y2 = jnp.zeros((cout, L), jnp.float32)
    for ki in range(3):
        for kj in range(3):
            t = (ki - 2) * W + (kj - 2)
            base = (ki * 3 + kj) * cmid
            y2 = y2 + jnp.dot(w2[:, base:base + cmid], shifted(y1, t),
                              preferred_element_type=jnp.float32)

    o_ref[...] = jnp.maximum(y2, 0.0).astype(o_ref.dtype)


def conv_pipe_forward(x_nchw, w1_oihw, w2_iohw):
    """ConvPipe forward.

    x_nchw : (N, Cin, H, W)      PyTorch NCHW input
    w1_oihw: (Cout, Cin, 3, 3)   nn.Conv2d weight
    w2_iohw: (Cout, Cout, 3, 3)  nn.ConvTranspose2d weight (in, out, kH, kW)
    returns: (N, Cout, H, W)
    """
    N, Cin, H, W = x_nchw.shape
    Cout = w1_oihw.shape[0]
    assert w1_oihw.shape[2:] == (3, 3) and w2_iohw.shape[2:] == (3, 3), "3x3 kernels expected"
    assert H >= 3 and W >= 3, "3x3 VALID conv needs H, W >= 3 (border must be exactly 2)"
    HW = H * W
    L = N * HW

    # Fold the batch onto the lane axis: (Cin, N*H*W), images concatenated row-major.
    x_folded = jnp.transpose(x_nchw, (1, 0, 2, 3)).reshape(Cin, L)

    # Pack weights once into kernel-friendly (out_ch, tap*in_ch) matrices.
    #   w1_p[co, (ki*3+kj)*Cin + ci] = w1[co, ci, ki, kj]
    w1_p = jnp.transpose(w1_oihw, (0, 2, 3, 1)).reshape(Cout, 9 * Cin)
    #   ConvTranspose == full conv with spatially flipped kernel and in/out swapped:
    #   w2_p[co, (ki*3+kj)*Cout + c1] = w2[c1, co, 2-ki, 2-kj]
    w2_p = jnp.transpose(w2_iohw[:, :, ::-1, ::-1], (1, 2, 3, 0)).reshape(Cout, 9 * Cout)

    kernel = functools.partial(conv_pipe_kernel, H=H, W=W, num_images=N)

    # Grid-less single invocation: whole problem is a few KiB of VMEM, so tiling or a
    # grid=(N,) batch loop would only add per-step overhead.  (On v7x, a grid=(N,)
    # "parallel" 2-TC split could be benchmarked against this folded version, but the
    # per-image compute is sub-microsecond so the single step is expected to win.)
    out_folded = pl.pallas_call(
        kernel,
        out_shape=jax.ShapeDtypeStruct((Cout, L), x_nchw.dtype),
    )(x_folded, w1_p, w2_p)

    return jnp.transpose(out_folded.reshape(Cout, N, H, W), (1, 0, 2, 3))


def conv_pipe_reference(x_nchw, w1_oihw, w2_iohw):
    """Pure-JAX reference (lax convolutions) for validation."""
    x = jnp.transpose(x_nchw, (0, 2, 3, 1))
    w1 = jnp.transpose(w1_oihw, (2, 3, 1, 0))
    y1 = lax.conv_general_dilated(
        x, w1, window_strides=(1, 1), padding="VALID",
        dimension_numbers=("NHWC", "HWIO", "NHWC"))
    y1 = jnp.maximum(y1, 0.0)
    w2 = jnp.transpose(w2_iohw[:, :, ::-1, ::-1], (2, 3, 0, 1))
    y2 = lax.conv_general_dilated(
        y1, w2, window_strides=(1, 1), padding=((2, 2), (2, 2)),
        dimension_numbers=("NHWC", "HWIO", "NHWC"))
    y2 = jnp.maximum(y2, 0.0)
    return jnp.transpose(y2, (0, 3, 1, 2))


if __name__ == "__main__":
    # Small shapes consistent with the module: batch=2, Cin=4, Cout=8, spatial=16.
    N, Cin, Cout, H, W = 2, 4, 8, 16, 16

    key = jax.random.PRNGKey(0)
    kx, k1, k2 = jax.random.split(key, 3)
    x = jax.random.normal(kx, (N, Cin, H, W), dtype=jnp.float32)
    w1 = jax.random.normal(k1, (Cout, Cin, 3, 3), dtype=jnp.float32) * 0.1   # Conv2d weight
    w2 = jax.random.normal(k2, (Cout, Cout, 3, 3), dtype=jnp.float32) * 0.1  # ConvTranspose2d weight

    out = jax.block_until_ready(jax.jit(conv_pipe_forward)(x, w1, w2))

    ref = conv_pipe_reference(x, w1, w2)
    assert out.shape == (N, Cout, H, W), out.shape
    max_err = float(jnp.max(jnp.abs(out - ref)))
    assert jnp.allclose(out, ref, rtol=1e-5, atol=1e-5), f"mismatch vs lax reference: {max_err}"

    print("KERNEL_OK")
</pallas_src>

<mosaic_0001>
module attributes {stable_mosaic.version = 11 : i64} {
  func.func @conv_pipe_kernel(%arg0: memref<4x512xf32, #tpu.memory_space<vmem>>, %arg1: memref<8x36xf32, #tpu.memory_space<vmem>>, %arg2: memref<8x72xf32, #tpu.memory_space<vmem>>, %arg3: memref<8x512xf32, #tpu.memory_space<vmem>>) attributes {dimension_semantics = [], scalar_prefetch = 0 : i64, scratch_operands = 0 : i64, tpu.core_type = #tpu.core_type<tc>} {
    %c0 = arith.constant 0 : index
    %c0_0 = arith.constant 0 : index
    %0 = vector.load %arg0[%c0, %c0_0] : memref<4x512xf32, #tpu.memory_space<vmem>>, vector<4x512xf32>
    %c0_1 = arith.constant 0 : index
    %c0_2 = arith.constant 0 : index
    %1 = vector.load %arg1[%c0_1, %c0_2] : memref<8x36xf32, #tpu.memory_space<vmem>>, vector<8x36xf32>
    %c0_3 = arith.constant 0 : index
    %c0_4 = arith.constant 0 : index
    %2 = vector.load %arg2[%c0_3, %c0_4] : memref<8x72xf32, #tpu.memory_space<vmem>>, vector<8x72xf32>
    %cst = arith.constant 0.000000e+00 : f32
    %3 = vector.broadcast %cst : f32 to vector<8x512xf32>
    %4 = vector.extract_strided_slice %1 {offsets = [0, 0], sizes = [8, 4], strides = [1, 1]} : vector<8x36xf32> to vector<8x4xf32>
    %cst_5 = arith.constant dense<0.000000e+00> : vector<8x512xf32>
    %5 = tpu.matmul %4, %0, %cst_5 {dimension_numbers = #tpu.dot_dimension_numbers<[1], [0], [0], [1], [0, 0, 1, 1], [], []>} : vector<8x4xf32>, vector<4x512xf32>, vector<8x512xf32> -> vector<8x512xf32>
    %6 = arith.addf %3, %5 : vector<8x512xf32>
    %7 = vector.extract_strided_slice %1 {offsets = [0, 4], sizes = [8, 4], strides = [1, 1]} : vector<8x36xf32> to vector<8x4xf32>
    %c511_i32 = arith.constant 511 : i32
    %8 = tpu.dynamic_rotate %0 by %c511_i32 dim 1 : vector<4x512xf32>, i32 -> vector<4x512xf32>
    %cst_6 = arith.constant dense<0.000000e+00> : vector<8x512xf32>
    %9 = tpu.matmul %7, %8, %cst_6 {dimension_numbers = #tpu.dot_dimension_numbers<[1], [0], [0], [1], [0, 0, 1, 1], [], []>} : vector<8x4xf32>, vector<4x512xf32>, vector<8x512xf32> -> vector<8x512xf32>
    %10 = arith.addf %6, %9 : vector<8x512xf32>
    %11 = vector.extract_strided_slice %1 {offsets = [0, 8], sizes = [8, 4], strides = [1, 1]} : vector<8x36xf32> to vector<8x4xf32>
    %c510_i32 = arith.constant 510 : i32
    %12 = tpu.dynamic_rotate %0 by %c510_i32 dim 1 : vector<4x512xf32>, i32 -> vector<4x512xf32>
    %cst_7 = arith.constant dense<0.000000e+00> : vector<8x512xf32>
    %13 = tpu.matmul %11, %12, %cst_7 {dimension_numbers = #tpu.dot_dimension_numbers<[1], [0], [0], [1], [0, 0, 1, 1], [], []>} : vector<8x4xf32>, vector<4x512xf32>, vector<8x512xf32> -> vector<8x512xf32>
    %14 = arith.addf %10, %13 : vector<8x512xf32>
    %15 = vector.extract_strided_slice %1 {offsets = [0, 12], sizes = [8, 4], strides = [1, 1]} : vector<8x36xf32> to vector<8x4xf32>
    %c496_i32 = arith.constant 496 : i32
    %16 = tpu.dynamic_rotate %0 by %c496_i32 dim 1 : vector<4x512xf32>, i32 -> vector<4x512xf32>
    %cst_8 = arith.constant dense<0.000000e+00> : vector<8x512xf32>
    %17 = tpu.matmul %15, %16, %cst_8 {dimension_numbers = #tpu.dot_dimension_numbers<[1], [0], [0], [1], [0, 0, 1, 1], [], []>} : vector<8x4xf32>, vector<4x512xf32>, vector<8x512xf32> -> vector<8x512xf32>
    %18 = arith.addf %14, %17 : vector<8x512xf32>
    %19 = vector.extract_strided_slice %1 {offsets = [0, 16], sizes = [8, 4], strides = [1, 1]} : vector<8x36xf32> to vector<8x4xf32>
    %c495_i32 = arith.constant 495 : i32
    %20 = tpu.dynamic_rotate %0 by %c495_i32 dim 1 : vector<4x512xf32>, i32 -> vector<4x512xf32>
    %cst_9 = arith.constant dense<0.000000e+00> : vector<8x512xf32>
    %21 = tpu.matmul %19, %20, %cst_9 {dimension_numbers = #tpu.dot_dimension_numbers<[1], [0], [0], [1], [0, 0, 1, 1], [], []>} : vector<8x4xf32>, vector<4x512xf32>, vector<8x512xf32> -> vector<8x512xf32>
    %22 = arith.addf %18, %21 : vector<8x512xf32>
    %23 = vector.extract_strided_slice %1 {offsets = [0, 20], sizes = [8, 4], strides = [1, 1]} : vector<8x36xf32> to vector<8x4xf32>
    %c494_i32 = arith.constant 494 : i32
    %24 = tpu.dynamic_rotate %0 by %c494_i32 dim 1 : vector<4x512xf32>, i32 -> vector<4x512xf32>
    %cst_10 = arith.constant dense<0.000000e+00> : vector<8x512xf32>
    %25 = tpu.matmul %23, %24, %cst_10 {dimension_numbers = #tpu.dot_dimension_numbers<[1], [0], [0], [1], [0, 0, 1, 1], [], []>} : vector<8x4xf32>, vector<4x512xf32>, vector<8x512xf32> -> vector<8x512xf32>
    %26 = arith.addf %22, %25 : vector<8x512xf32>
    %27 = vector.extract_strided_slice %1 {offsets = [0, 24], sizes = [8, 4], strides = [1, 1]} : vector<8x36xf32> to vector<8x4xf32>
    %c480_i32 = arith.constant 480 : i32
    %28 = tpu.dynamic_rotate %0 by %c480_i32 dim 1 : vector<4x512xf32>, i32 -> vector<4x512xf32>
    %cst_11 = arith.constant dense<0.000000e+00> : vector<8x512xf32>
    %29 = tpu.matmul %27, %28, %cst_11 {dimension_numbers = #tpu.dot_dimension_numbers<[1], [0], [0], [1], [0, 0, 1, 1], [], []>} : vector<8x4xf32>, vector<4x512xf32>, vector<8x512xf32> -> vector<8x512xf32>
    %30 = arith.addf %26, %29 : vector<8x512xf32>
    %31 = vector.extract_strided_slice %1 {offsets = [0, 28], sizes = [8, 4], strides = [1, 1]} : vector<8x36xf32> to vector<8x4xf32>
    %c479_i32 = arith.constant 479 : i32
    %32 = tpu.dynamic_rotate %0 by %c479_i32 dim 1 : vector<4x512xf32>, i32 -> vector<4x512xf32>
    %cst_12 = arith.constant dense<0.000000e+00> : vector<8x512xf32>
    %33 = tpu.matmul %31, %32, %cst_12 {dimension_numbers = #tpu.dot_dimension_numbers<[1], [0], [0], [1], [0, 0, 1, 1], [], []>} : vector<8x4xf32>, vector<4x512xf32>, vector<8x512xf32> -> vector<8x512xf32>
    %34 = arith.addf %30, %33 : vector<8x512xf32>
    %35 = vector.extract_strided_slice %1 {offsets = [0, 32], sizes = [8, 4], strides = [1, 1]} : vector<8x36xf32> to vector<8x4xf32>
    %c478_i32 = arith.constant 478 : i32
    %36 = tpu.dynamic_rotate %0 by %c478_i32 dim 1 : vector<4x512xf32>, i32 -> vector<4x512xf32>
    %cst_13 = arith.constant dense<0.000000e+00> : vector<8x512xf32>
    %37 = tpu.matmul %35, %36, %cst_13 {dimension_numbers = #tpu.dot_dimension_numbers<[1], [0], [0], [1], [0, 0, 1, 1], [], []>} : vector<8x4xf32>, vector<4x512xf32>, vector<8x512xf32> -> vector<8x512xf32>
    %38 = arith.addf %34, %37 : vector<8x512xf32>
    %39 = tpu.iota {dimensions = array<i32: 1>} : vector<1x512xi32>
    %c16_i32 = arith.constant 16 : i32
    %c0_i32 = arith.constant 0 : i32
    %40 = arith.cmpi eq, %c16_i32, %c0_i32 : i32
    %c1_i32 = arith.constant 1 : i32
    %41 = arith.select %40, %c1_i32, %c16_i32 : i32
    %42 = vector.broadcast %41 : i32 to vector<1x512xi32>
    %43 = arith.remsi %39, %42 : vector<1x512xi32>
    %c0_i32_14 = arith.constant 0 : i32
    %44 = vector.broadcast %c0_i32_14 : i32 to vector<1x512xi32>
    %45 = arith.cmpi ne, %43, %44 : vector<1x512xi32>
    %c0_i32_15 = arith.constant 0 : i32
    %46 = vector.broadcast %c0_i32_15 : i32 to vector<1x512xi32>
    %47 = arith.cmpi slt, %43, %46 : vector<1x512xi32>
    %c0_i32_16 = arith.constant 0 : i32
    %48 = arith.cmpi slt, %41, %c0_i32_16 : i32
    %49 = vector.broadcast %48 : i1 to vector<1x512xi1>
    %50 = vector.broadcast %49 : vector<1x512xi1> to vector<1x512xi1>
    %51 = arith.xori %47, %50 : vector<1x512xi1>
    %52 = arith.andi %51, %45 : vector<1x512xi1>
    %53 = vector.broadcast %41 : i32 to vector<1x512xi32>
    %54 = arith.addi %43, %53 : vector<1x512xi32>
    %55 = arith.select %52, %54, %43 : vector<1x512xi1>, vector<1x512xi32>
    %c14_i32 = arith.constant 14 : i32
    %56 = vector.broadcast %c14_i32 : i32 to vector<1x512xi32>
    %57 = arith.cmpi slt, %55, %56 : vector<1x512xi32>
    %c256_i32 = arith.constant 256 : i32
    %c0_i32_17 = arith.constant 0 : i32
    %58 = arith.cmpi eq, %c256_i32, %c0_i32_17 : i32
    %c1_i32_18 = arith.constant 1 : i32
    %59 = arith.select %58, %c1_i32_18, %c256_i32 : i32
    %60 = vector.broadcast %59 : i32 to vector<1x512xi32>
    %61 = arith.remsi %39, %60 : vector<1x512xi32>
    %c0_i32_19 = arith.constant 0 : i32
    %62 = vector.broadcast %c0_i32_19 : i32 to vector<1x512xi32>
    %63 = arith.cmpi ne, %61, %62 : vector<1x512xi32>
    %c0_i32_20 = arith.constant 0 : i32
    %64 = vector.broadcast %c0_i32_20 : i32 to vector<1x512xi32>
    %65 = arith.cmpi slt, %61, %64 : vector<1x512xi32>
    %c0_i32_21 = arith.constant 0 : i32
    %66 = arith.cmpi slt, %59, %c0_i32_21 : i32
    %67 = vector.broadcast %66 : i1 to vector<1x512xi1>
    %68 = vector.broadcast %67 : vector<1x512xi1> to vector<1x512xi1>
    %69 = arith.xori %65, %68 : vector<1x512xi1>
    %70 = arith.andi %69, %63 : vector<1x512xi1>
    %71 = vector.broadcast %59 : i32 to vector<1x512xi32>
    %72 = arith.addi %61, %71 : vector<1x512xi32>
    %73 = arith.select %70, %72, %61 : vector<1x512xi1>, vector<1x512xi32>
    %c224_i32 = arith.constant 224 : i32
    %74 = vector.broadcast %c224_i32 : i32 to vector<1x512xi32>
    %75 = arith.cmpi slt, %73, %74 : vector<1x512xi32>
    %76 = arith.andi %57, %75 : vector<1x512xi1>
    %cst_22 = arith.constant 0.000000e+00 : f32
    %77 = vector.broadcast %cst_22 : f32 to vector<8x512xf32>
    %78 = arith.maximumf %38, %77 : vector<8x512xf32>
    %cst_23 = arith.constant 0.000000e+00 : f32
    %79 = vector.shape_cast %76 : vector<1x512xi1> to vector<1x512xi1>
    %80 = vector.broadcast %79 : vector<1x512xi1> to vector<8x512xi1>
    %81 = vector.broadcast %cst_23 : f32 to vector<8x512xf32>
    %82 = arith.select %80, %78, %81 : vector<8x512xi1>, vector<8x512xf32>
    %cst_24 = arith.constant 0.000000e+00 : f32
    %83 = vector.broadcast %cst_24 : f32 to vector<8x512xf32>
    %84 = vector.extract_strided_slice %2 {offsets = [0, 0], sizes = [8, 8], strides = [1, 1]} : vector<8x72xf32> to vector<8x8xf32>
    %c34_i32 = arith.constant 34 : i32
    %85 = tpu.dynamic_rotate %82 by %c34_i32 dim 1 : vector<8x512xf32>, i32 -> vector<8x512xf32>
    %cst_25 = arith.constant dense<0.000000e+00> : vector<8x512xf32>
    %86 = tpu.matmul %84, %85, %cst_25 {dimension_numbers = #tpu.dot_dimension_numbers<[1], [0], [0], [1], [0, 0, 1, 1], [], []>} : vector<8x8xf32>, vector<8x512xf32>, vector<8x512xf32> -> vector<8x512xf32>
    %87 = arith.addf %83, %86 : vector<8x512xf32>
    %88 = vector.extract_strided_slice %2 {offsets = [0, 8], sizes = [8, 8], strides = [1, 1]} : vector<8x72xf32> to vector<8x8xf32>
    %c33_i32 = arith.constant 33 : i32
    %89 = tpu.dynamic_rotate %82 by %c33_i32 dim 1 : vector<8x512xf32>, i32 -> vector<8x512xf32>
    %cst_26 = arith.constant dense<0.000000e+00> : vector<8x512xf32>
    %90 = tpu.matmul %88, %89, %cst_26 {dimension_numbers = #tpu.dot_dimension_numbers<[1], [0], [0], [1], [0, 0, 1, 1], [], []>} : vector<8x8xf32>, vector<8x512xf32>, vector<8x512xf32> -> vector<8x512xf32>
    %91 = arith.addf %87, %90 : vector<8x512xf32>
    %92 = vector.extract_strided_slice %2 {offsets = [0, 16], sizes = [8, 8], strides = [1, 1]} : vector<8x72xf32> to vector<8x8xf32>
    %c32_i32 = arith.constant 32 : i32
    %93 = tpu.dynamic_rotate %82 by %c32_i32 dim 1 : vector<8x512xf32>, i32 -> vector<8x512xf32>
    %cst_27 = arith.constant dense<0.000000e+00> : vector<8x512xf32>
    %94 = tpu.matmul %92, %93, %cst_27 {dimension_numbers = #tpu.dot_dimension_numbers<[1], [0], [0], [1], [0, 0, 1, 1], [], []>} : vector<8x8xf32>, vector<8x512xf32>, vector<8x512xf32> -> vector<8x512xf32>
    %95 = arith.addf %91, %94 : vector<8x512xf32>
    %96 = vector.extract_strided_slice %2 {offsets = [0, 24], sizes = [8, 8], strides = [1, 1]} : vector<8x72xf32> to vector<8x8xf32>
    %c18_i32 = arith.constant 18 : i32
    %97 = tpu.dynamic_rotate %82 by %c18_i32 dim 1 : vector<8x512xf32>, i32 -> vector<8x512xf32>
    %cst_28 = arith.constant dense<0.000000e+00> : vector<8x512xf32>
    %98 = tpu.matmul %96, %97, %cst_28 {dimension_numbers = #tpu.dot_dimension_numbers<[1], [0], [0], [1], [0, 0, 1, 1], [], []>} : vector<8x8xf32>, vector<8x512xf32>, vector<8x512xf32> -> vector<8x512xf32>
    %99 = arith.addf %95, %98 : vector<8x512xf32>
    %100 = vector.extract_strided_slice %2 {offsets = [0, 32], sizes = [8, 8], strides = [1, 1]} : vector<8x72xf32> to vector<8x8xf32>
    %c17_i32 = arith.constant 17 : i32
    %101 = tpu.dynamic_rotate %82 by %c17_i32 dim 1 : vector<8x512xf32>, i32 -> vector<8x512xf32>
    %cst_29 = arith.constant dense<0.000000e+00> : vector<8x512xf32>
    %102 = tpu.matmul %100, %101, %cst_29 {dimension_numbers = #tpu.dot_dimension_numbers<[1], [0], [0], [1], [0, 0, 1, 1], [], []>} : vector<8x8xf32>, vector<8x512xf32>, vector<8x512xf32> -> vector<8x512xf32>
    %103 = arith.addf %99, %102 : vector<8x512xf32>
    %104 = vector.extract_strided_slice %2 {offsets = [0, 40], sizes = [8, 8], strides = [1, 1]} : vector<8x72xf32> to vector<8x8xf32>
    %c16_i32_30 = arith.constant 16 : i32
    %105 = tpu.dynamic_rotate %82 by %c16_i32_30 dim 1 : vector<8x512xf32>, i32 -> vector<8x512xf32>
    %cst_31 = arith.constant dense<0.000000e+00> : vector<8x512xf32>
    %106 = tpu.matmul %104, %105, %cst_31 {dimension_numbers = #tpu.dot_dimension_numbers<[1], [0], [0], [1], [0, 0, 1, 1], [], []>} : vector<8x8xf32>, vector<8x512xf32>, vector<8x512xf32> -> vector<8x512xf32>
    %107 = arith.addf %103, %106 : vector<8x512xf32>
    %108 = vector.extract_strided_slice %2 {offsets = [0, 48], sizes = [8, 8], strides = [1, 1]} : vector<8x72xf32> to vector<8x8xf32>
    %c2_i32 = arith.constant 2 : i32
    %109 = tpu.dynamic_rotate %82 by %c2_i32 dim 1 : vector<8x512xf32>, i32 -> vector<8x512xf32>
    %cst_32 = arith.constant dense<0.000000e+00> : vector<8x512xf32>
    %110 = tpu.matmul %108, %109, %cst_32 {dimension_numbers = #tpu.dot_dimension_numbers<[1], [0], [0], [1], [0, 0, 1, 1], [], []>} : vector<8x8xf32>, vector<8x512xf32>, vector<8x512xf32> -> vector<8x512xf32>
    %111 = arith.addf %107, %110 : vector<8x512xf32>
    %112 = vector.extract_strided_slice %2 {offsets = [0, 56], sizes = [8, 8], strides = [1, 1]} : vector<8x72xf32> to vector<8x8xf32>
    %c1_i32_33 = arith.constant 1 : i32
    %113 = tpu.dynamic_rotate %82 by %c1_i32_33 dim 1 : vector<8x512xf32>, i32 -> vector<8x512xf32>
    %cst_34 = arith.constant dense<0.000000e+00> : vector<8x512xf32>
    %114 = tpu.matmul %112, %113, %cst_34 {dimension_numbers = #tpu.dot_dimension_numbers<[1], [0], [0], [1], [0, 0, 1, 1], [], []>} : vector<8x8xf32>, vector<8x512xf32>, vector<8x512xf32> -> vector<8x512xf32>
    %115 = arith.addf %111, %114 : vector<8x512xf32>
    %116 = vector.extract_strided_slice %2 {offsets = [0, 64], sizes = [8, 8], strides = [1, 1]} : vector<8x72xf32> to vector<8x8xf32>
    %cst_35 = arith.constant dense<0.000000e+00> : vector<8x512xf32>
    %117 = tpu.matmul %116, %82, %cst_35 {dimension_numbers = #tpu.dot_dimension_numbers<[1], [0], [0], [1], [0, 0, 1, 1], [], []>} : vector<8x8xf32>, vector<8x512xf32>, vector<8x512xf32> -> vector<8x512xf32>
    %118 = arith.addf %115, %117 : vector<8x512xf32>
    %cst_36 = arith.constant 0.000000e+00 : f32
    %119 = vector.broadcast %cst_36 : f32 to vector<8x512xf32>
    %120 = arith.maximumf %118, %119 : vector<8x512xf32>
    %c0_37 = arith.constant 0 : index
    %c0_38 = arith.constant 0 : index
    %121 = vector.load %arg3[%c0_37, %c0_38] : memref<8x512xf32, #tpu.memory_space<vmem>>, vector<8x512xf32>
    tpu.vector_store %arg3[%c0_37, %c0_38], %120 {strides = array<i32>} : memref<8x512xf32, #tpu.memory_space<vmem>>, vector<8x512xf32>,
    return
  }
}

</mosaic_0001>

<bundles_post_ra>
// kernel: conv_pipe_forward.1
= control target key start
LH: loop header
LB: loop body
LE: loop exit
PB: predicated region body
PF: predicated region fallthrough
CT: control target
= control target key end

     0   :  { %v3331_v2 = vmov 0.0   ;;  %s3332_s16 = smov 127   ;;  %s3333_s18 = smov 126   ;;  %v32_v7 = vlaneseq  ;;  %vm45_vm1 = vcmask 1043456   ;;  %vm42_vm2 = vcmask 31744   ;;  %s3736_s0 = inlined_call_operand.vmem [shape: f32[4,512], index: 0, kind: input, shape index: {}]   ;;  %s3737_s1 = inlined_call_operand.vmem [shape: f32[8,36], index: 1, kind: input, shape index: {}]   ;;  %s3738_s2 = inlined_call_operand.vmem [shape: f32[8,72], index: 2, kind: input, shape index: {}]   ;;  %s3739_s3 = inlined_call_operand.vmem [shape: f32[8,512], index: 3, kind: output, shape index: {}]  }
   0x1   :  { %v3381_v0 = vld [vmem:[%s3736_s0 + $0x8] sm:$0xff]  ;;  %v3386_v1 = vld [vmem:[%s3736_s0] sm:$0xff]  ;;  %122 = vmatprep.mubr.f32.mxu0 %v3331_v2  ;;  %193 = vmatprep.mubr.f32.mxu1 %v3331_v2  ;;  %s3334_s19 = smov 124   ;;  %s3335_s20 = smov 120  }
   0x2   :  { %28 = vrot.lane.b32.xlu1 %v3381_v0, %s3332_s16  ;;  %24 = vrot.lane.b32.xlu0 %v3386_v1, %s3332_s16  ;;  %v3394_v3 = vcombine.high %v3381_v0, %v3381_v0  ;;  %v3398_v4 = vcombine.high %v3386_v1, %v3386_v1  ;;  %v3405_v5 = vld [vmem:[%s3737_s1] sm:$0xff]  ;;  %s3336_s21 = smov 112   ;;  %s3337_s1 = smov 111   ;;  %v3462_v8 = vand.u32 127, %v32_v7 }
   0x3   :  { %s3338_s22 = smov 116   ;;  %s3339_s23 = smov 110   ;;  %v3458_v6 = vld [vmem:[%s3738_s2] sm:$0xff] }
   0x4   :  { %s3340_s24 = smov 96   ;;  %s3341_s25 = smov 108   ;;  %vm34_vm0 = vcmp.lt.s32.totalorder %v3462_v8, 127  ;;  %vm360_vm3 = vcmp.lt.s32.totalorder %v3462_v8, 126  ;;  %vm535_vm4 = vcmp.lt.s32.totalorder %v3462_v8, 112  ;;  %vm710_vm5 = vcmp.lt.s32.totalorder %v3462_v8, 111 }
   0x5   :  { %s3342_s26 = smov 104   ;;  %s3343_s27 = smov 95   ;;  %vm885_vm6 = vcmp.lt.s32.totalorder %v3462_v8, 110  ;;  %vm1060_vm7 = vcmp.lt.s32.totalorder %v3462_v8, 96  ;;  %vm1235_vm8 = vcmp.lt.s32.totalorder %v3462_v8, 95  ;;  %vm1410_vm9 = vcmp.lt.s32.totalorder %v3462_v8, 94 }
   0x6   :  { %30 = vrot.lane.b32.xlu1 %v3394_v3, %s3332_s16  ;;  %26 = vrot.lane.b32.xlu0 %v3398_v4, %s3332_s16  ;;  %s3344_s28 = smov 94   ;;  %s3345_s29 = smov 100  }
   0x7   :  { %s3346_s2 = smov 34   ;;  %s3347_s5 = smov 33  }
   0x8   :  { %s3348_s6 = smov 32   ;;  %s3349_s7 = smov 18  }
   0x9   :  { %s3350_s8 = smov 17   ;;  %s3351_s9 = smov 16  }
   0xa   :  { %352 = vrot.lane.b32.xlu1 %v3386_v1, %s3333_s18  ;;  %40 = vrot.lane.b32.xlu0 %v3405_v5, %s3334_s19  ;;  %s3352_s10 = smov 2   ;;  %s3353_s11 = smov 88  }
   0xb   :  { %s3354_s12 = smov 1   ;;  %s3355_s13 = smov 80  }
   0xc   :  { %s3356_s14 = smov 72   ;;  %s3357_s15 = smov 64  }
   0xe   :  { %356 = vrot.lane.b32.xlu1 %v3381_v0, %s3333_s18  ;;  %354 = vrot.lane.b32.xlu0 %v3398_v4, %s3333_s18 }
  0x12   :  { %365 = vrot.lane.b32.xlu1 %v3405_v5, %s3335_s20  ;;  %358 = vrot.lane.b32.xlu0 %v3394_v3, %s3333_s18 }
  0x16   :  { %529 = vrot.lane.b32.xlu1 %v3398_v4, %s3336_s21  ;;  %527 = vrot.lane.b32.xlu0 %v3386_v1, %s3336_s21 }
  0x1a   :  { %533 = vrot.lane.b32.xlu1 %v3394_v3, %s3336_s21  ;;  %531 = vrot.lane.b32.xlu0 %v3381_v0, %s3336_s21 }
  0x1e   :  { %702 = vrot.lane.b32.xlu1 %v3386_v1, %s3337_s1  ;;  %540 = vrot.lane.b32.xlu0 %v3405_v5, %s3338_s22 }
  0x22   :  { %706 = vrot.lane.b32.xlu1 %v3381_v0, %s3337_s1  ;;  %704 = vrot.lane.b32.xlu0 %v3398_v4, %s3337_s1 }
  0x26   :  { %715 = vrot.lane.b32.xlu1 %v3405_v5, %s3336_s21  ;;  %708 = vrot.lane.b32.xlu0 %v3394_v3, %s3337_s1 }
  0x2a   :  { %879 = vrot.lane.b32.xlu1 %v3398_v4, %s3339_s23  ;;  %877 = vrot.lane.b32.xlu0 %v3386_v1, %s3339_s23 }
  0x2e   :  { %883 = vrot.lane.b32.xlu1 %v3394_v3, %s3339_s23  ;;  %881 = vrot.lane.b32.xlu0 %v3381_v0, %s3339_s23 }
  0x32   :  { %1052 = vrot.lane.b32.xlu1 %v3386_v1, %s3340_s24  ;;  %890 = vrot.lane.b32.xlu0 %v3405_v5, %s3341_s25 }
  0x36   :  { %1056 = vrot.lane.b32.xlu1 %v3381_v0, %s3340_s24  ;;  %1054 = vrot.lane.b32.xlu0 %v3398_v4, %s3340_s24 }
  0x3a   :  { %1065 = vrot.lane.b32.xlu1 %v3405_v5, %s3342_s26  ;;  %1058 = vrot.lane.b32.xlu0 %v3394_v3, %s3340_s24 }
  0x3e   :  { %1229 = vrot.lane.b32.xlu1 %v3398_v4, %s3343_s27  ;;  %1227 = vrot.lane.b32.xlu0 %v3386_v1, %s3343_s27 }
  0x42   :  { %1233 = vrot.lane.b32.xlu1 %v3394_v3, %s3343_s27  ;;  %1231 = vrot.lane.b32.xlu0 %v3381_v0, %s3343_s27 }
  0x46   :  { %1402 = vrot.lane.b32.xlu1 %v3386_v1, %s3344_s28  ;;  %1240 = vrot.lane.b32.xlu0 %v3405_v5, %s3345_s29 }
  0x4a   :  { %1406 = vrot.lane.b32.xlu1 %v3381_v0, %s3344_s28  ;;  %1404 = vrot.lane.b32.xlu0 %v3398_v4, %s3344_s28 }
  0x4e   :  { %1415 = vrot.lane.b32.xlu1 %v3405_v5, %s3340_s24  ;;  %1408 = vrot.lane.b32.xlu0 %v3394_v3, %s3344_s28 }
  0x52   :  { %1731 = vrot.lane.b32.xlu0 %v3458_v6, %s3335_s20 }
  0x74   :  { %v29_v9 = vpop.permute.xlu1 %28  ;;  %v25_v10 = vpop.permute.xlu0 %24 }
  0x78   :  { %v31_v11 = vpop.permute.xlu1 %30  ;;  %v27_v12 = vpop.permute.xlu0 %26 }
  0x79   :  { %v36_v13 = vsel %vm34_vm0, %v27_v12, %v29_v9  ;;  %v38_v14 = vsel %vm34_vm0, %v31_v11, %v25_v10  ;;  %v37_v15 = vsel %vm34_vm0, %v25_v10, %v27_v12  ;;  %v35_v16 = vsel %vm34_vm0, %v29_v9, %v31_v11 }
  0x7a   :  { %3162 = vmatprep.subr.msk.mxu0 %vm45_vm1, %v36_v13  ;;  %3165 = vmatprep.subr.msk.mxu1 %vm45_vm1, %v38_v14 }
  0x7b   :  { %3163 = vmatpush1.msk.msra.mxu0 %vm45_vm1, %v37_v15  ;;  %3166 = vmatpush1.msk.msra.mxu1 %vm45_vm1, %v35_v16 }
  0x7c   :  { %v353_v17 = vpop.permute.xlu1 %352  ;;  %v41_v18 = vpop.permute.xlu0 %40  ;;  %3168 = vmatprep.subr.msk.mxu0 %vm45_vm1, %v3398_v4  ;;  %3171 = vmatprep.subr.msk.mxu1 %vm45_vm1, %v3394_v3 }
  0x7d   :  { %3164 = vmatmul.mubr.msk.f32.vlgmr.msra.gmra.mrb[0].mxu0 %vm42_vm2, %v41_v18  ;;  %3167 = vmatmul.mubr.msk.f32.vlgmr.msra.gmra.mrb[0].mxu1 %vm42_vm2, %v41_v18 }
  0x7e   :  { %3169 = vmatpush1.msk.msra.mxu0 %vm45_vm1, %v3386_v1  ;;  %274 = vmatprep.mubr.f32.mxu0 %v3331_v2 }
  0x7f   :  { %3172 = vmatpush1.msk.msra.mxu1 %vm45_vm1, %v3381_v0  ;;  %345 = vmatprep.mubr.f32.mxu1 %v3331_v2 }
  0x80   :  { %v357_v19 = vpop.permute.xlu1 %356  ;;  %v355_v20 = vpop.permute.xlu0 %354 }
  0x81   :  { %v362_v21 = vsel %vm360_vm3, %v355_v20, %v357_v19  ;;  %v363_v24 = vsel %vm360_vm3, %v353_v17, %v355_v20  ;;  %v1578_v20 = vadd.s32 256, %v3462_v8 }
  0x82   :  { %3174 = vmatprep.subr.msk.mxu0 %vm45_vm1, %v362_v21  ;;  %v1584_v21 = vand.u32 15, %v3462_v8 }
  0x84   :  { %v366_v22 = vpop.permute.xlu1 %365  ;;  %v359_v23 = vpop.permute.xlu0 %358  ;;  %vm3554_vm10 = vcmp.lt.s32.totalorder %v1584_v21, 14 }
  0x85   :  { %v361_v25 = vsel %vm360_vm3, %v357_v19, %v359_v23  ;;  %v364_v26 = vsel %vm360_vm3, %v359_v23, %v353_v17  ;;  %3170 = vmatmul.mubr.msk.f32.vlgmr.msra.gmra.mrb[0].mxu0 %vm42_vm2, %v3405_v5  ;;  %3173 = vmatmul.mubr.msk.f32.vlgmr.msra.gmra.mrb[0].mxu1 %vm42_vm2, %v3405_v5  ;;  %vm1712_vm3 = vcmp.lt.s32.totalorder %v3462_v8, 34 }
  0x86   :  { %3175 = vmatpush1.msk.msra.mxu0 %vm45_vm1, %v363_v24  ;;  %3177 = vmatprep.subr.msk.mxu1 %vm45_vm1, %v364_v26 }
  0x87   :  { %3178 = vmatpush1.msk.msra.mxu1 %vm45_vm1, %v361_v25  ;;  %445 = vmatprep.mubr.f32.mxu0 %v3331_v2 }
  0x88   :  { %v530_v27 = vpop.permute.xlu1 %529  ;;  %v528_v28 = vpop.permute.xlu0 %527  ;;  %516 = vmatprep.mubr.f32.mxu1 %v3331_v2 }
  0x89   :  { %v538_v34 = vsel %vm535_vm4, %v528_v28, %v530_v27 }
  0x8c   :  { %v534_v29 = vpop.permute.xlu1 %533  ;;  %v532_v30 = vpop.permute.xlu0 %531 }
  0x8d   :  { %v539_v31 = vsel %vm535_vm4, %v534_v29, %v528_v28  ;;  %v536_v32 = vsel %vm535_vm4, %v532_v30, %v534_v29  ;;  %v537_v33 = vsel %vm535_vm4, %v530_v27, %v532_v30  ;;  %3176 = vmatmul.mubr.msk.f32.vlgmr.msra.gmra.mrb[0].mxu0 %vm42_vm2, %v366_v22  ;;  %3179 = vmatmul.mubr.msk.f32.vlgmr.msra.gmra.mrb[0].mxu1 %vm42_vm2, %v366_v22  ;;  %v1598_v22 = vand.u32 15, %v1578_v20 }
  0x8e   :  { %3180 = vmatprep.subr.msk.mxu0 %vm45_vm1, %v537_v33  ;;  %3183 = vmatprep.subr.msk.mxu1 %vm45_vm1, %v539_v31  ;;  %v1577_v27 = vadd.s32 128, %v3462_v8  ;;  %vm1733_vm4 = vcmask 64512  }
  0x8f   :  { %3181 = vmatpush1.msk.msra.mxu0 %vm45_vm1, %v538_v34  ;;  %3184 = vmatpush1.msk.msra.mxu1 %vm45_vm1, %v536_v32  ;;  %vm3568_vm11 = vcmp.lt.s32.totalorder %v1598_v22, 14 }
  0x90   :  { %v703_v35 = vpop.permute.xlu1 %702  ;;  %v541_v36 = vpop.permute.xlu0 %540  ;;  %620 = vmatprep.mubr.f32.mxu0 %v3331_v2  ;;  %691 = vmatprep.mubr.f32.mxu1 %v3331_v2  ;;  %v1591_v33 = vand.u32 15, %v1577_v27  ;;  %v1643_v34 = vand.u32 255, %v1577_v27 }
  0x92   :  { %vm3582_vm12 = vcmp.lt.s32.totalorder %v1591_v33, 14  ;;  %vm3586_vm13 = vcmp.lt.s32.totalorder %v1643_v34, 224 }
  0x93   :  { %vm1685_vm14 = vmand %vm3582_vm12, %vm3586_vm13 }
  0x94   :  { %v707_v37 = vpop.permute.xlu1 %706  ;;  %v705_v38 = vpop.permute.xlu0 %704 }
  0x95   :  { %v712_v39 = vsel %vm710_vm5, %v705_v38, %v707_v37  ;;  %v713_v40 = vsel %vm710_vm5, %v703_v35, %v705_v38  ;;  %3182 = vmatmul.mubr.msk.f32.vlgmr.msra.gmra.mrb[0].mxu0 %vm42_vm2, %v541_v36  ;;  %3185 = vmatmul.mubr.msk.f32.vlgmr.msra.gmra.mrb[0].mxu1 %vm42_vm2, %v541_v36 }
  0x96   :  { %3186 = vmatprep.subr.msk.mxu0 %vm45_vm1, %v712_v39  ;;  %795 = vmatprep.mubr.f32.mxu0 %v3331_v2 }
  0x97   :  { %3187 = vmatpush1.msk.msra.mxu0 %vm45_vm1, %v713_v40  ;;  %866 = vmatprep.mubr.f32.mxu1 %v3331_v2 }
  0x98   :  { %v716_v41 = vpop.permute.xlu1 %715  ;;  %v709_v42 = vpop.permute.xlu0 %708 }
  0x99   :  { %v711_v43 = vsel %vm710_vm5, %v707_v37, %v709_v42  ;;  %v714_v44 = vsel %vm710_vm5, %v709_v42, %v703_v35  ;;  %v1579_v35 = vadd.s32 384, %v3462_v8  ;;  %vm2030_vm5 = vcmp.lt.s32.totalorder %v3462_v8, 32 }
  0x9a   :  { %3189 = vmatprep.subr.msk.mxu1 %vm45_vm1, %v714_v44 }
  0x9b   :  { %3190 = vmatpush1.msk.msra.mxu1 %vm45_vm1, %v711_v43  ;;  %v1605_v39 = vand.u32 15, %v1579_v35  ;;  %v1657_v40 = vand.u32 255, %v1579_v35 }
  0x9c   :  { %v880_v45 = vpop.permute.xlu1 %879  ;;  %v878_v46 = vpop.permute.xlu0 %877 }
  0x9d   :  { %3188 = vmatmul.mubr.msk.f32.vlgmr.msra.gmra.mrb[0].mxu0 %vm42_vm2, %v716_v41  ;;  %3191 = vmatmul.mubr.msk.f32.vlgmr.msra.gmra.mrb[0].mxu1 %vm42_vm2, %v716_v41  ;;  %v888_v52 = vsel %vm885_vm6, %v878_v46, %v880_v45  ;;  %vm3595_vm15 = vcmp.lt.s32.totalorder %v1605_v39, 14  ;;  %vm3599_vm0 = vcmp.lt.s32.totalorder %v1657_v40, 224 }
  0x9e   :  { %970 = vmatprep.mubr.f32.mxu0 %v3331_v2  ;;  %1041 = vmatprep.mubr.f32.mxu1 %v3331_v2 }
  0xa0   :  { %v884_v47 = vpop.permute.xlu1 %883  ;;  %v882_v48 = vpop.permute.xlu0 %881 }
  0xa1   :  { %v889_v49 = vsel %vm885_vm6, %v884_v47, %v878_v46  ;;  %v886_v50 = vsel %vm885_vm6, %v882_v48, %v884_v47  ;;  %v887_v51 = vsel %vm885_vm6, %v880_v45, %v882_v48  ;;  %vm2193_vm6 = vcmp.lt.s32.totalorder %v3462_v8, 18 }
  0xa2   :  { %3192 = vmatprep.subr.msk.mxu0 %vm45_vm1, %v887_v51  ;;  %3195 = vmatprep.subr.msk.mxu1 %vm45_vm1, %v889_v49 }
  0xa3   :  { %3193 = vmatpush1.msk.msra.mxu0 %vm45_vm1, %v888_v52  ;;  %3196 = vmatpush1.msk.msra.mxu1 %vm45_vm1, %v886_v50 }
  0xa4   :  { %v1053_v53 = vpop.permute.xlu1 %1052  ;;  %v891_v54 = vpop.permute.xlu0 %890 }
  0xa5   :  { %3194 = vmatmul.mubr.msk.f32.vlgmr.msra.gmra.mrb[0].mxu0 %vm42_vm2, %v891_v54  ;;  %3197 = vmatmul.mubr.msk.f32.vlgmr.msra.gmra.mrb[0].mxu1 %vm42_vm2, %v891_v54 }
  0xa6   :  { %1145 = vmatprep.mubr.f32.mxu0 %v3331_v2  ;;  %1216 = vmatprep.mubr.f32.mxu1 %v3331_v2 }
  0xa8   :  { %v1057_v55 = vpop.permute.xlu1 %1056  ;;  %v1055_v56 = vpop.permute.xlu0 %1054 }
  0xa9   :  { %v1062_v57 = vsel %vm1060_vm7, %v1055_v56, %v1057_v55  ;;  %v1063_v58 = vsel %vm1060_vm7, %v1053_v53, %v1055_v56 }
  0xaa   :  { %3198 = vmatprep.subr.msk.mxu0 %vm45_vm1, %v1062_v57 }
  0xab   :  { %3199 = vmatpush1.msk.msra.mxu0 %vm45_vm1, %v1063_v58 }
  0xac   :  { %v1066_v59 = vpop.permute.xlu1 %1065  ;;  %v1059_v60 = vpop.permute.xlu0 %1058 }
  0xad   :  { %v1061_v61 = vsel %vm1060_vm7, %v1057_v55, %v1059_v60  ;;  %v1064_v62 = vsel %vm1060_vm7, %v1059_v60, %v1053_v53  ;;  %3200 = vmatmul.mubr.msk.f32.vlgmr.msra.gmra.mrb[0].mxu0 %vm42_vm2, %v1066_v59  ;;  %vm2356_vm7 = vcmp.lt.s32.totalorder %v3462_v8, 17 }
  0xae   :  { %3201 = vmatprep.subr.msk.mxu1 %vm45_vm1, %v1064_v62  ;;  %1320 = vmatprep.mubr.f32.mxu0 %v3331_v2 }
  0xaf   :  { %3202 = vmatpush1.msk.msra.mxu1 %vm45_vm1, %v1061_v61 }
  0xb0   :  { %v1230_v63 = vpop.permute.xlu1 %1229  ;;  %3203 = vmatmul.mubr.msk.f32.vlgmr.msra.gmra.mrb[0].mxu1 %vm42_vm2, %v1066_v59  ;;  %v1228_v0 = vpop.permute.xlu0 %1227 }
  0xb1   :  { %1391 = vmatprep.mubr.f32.mxu1 %v3331_v2  ;;  %v1238_v9 = vsel %vm1235_vm8, %v1228_v0, %v1230_v63 }
  0xb4   :  { %v1234_v1 = vpop.permute.xlu1 %1233  ;;  %v1232_v3 = vpop.permute.xlu0 %1231 }
  0xb5   :  { %v1239_v4 = vsel %vm1235_vm8, %v1234_v1, %v1228_v0  ;;  %v1236_v5 = vsel %vm1235_vm8, %v1232_v3, %v1234_v1  ;;  %v1237_v7 = vsel %vm1235_vm8, %v1230_v63, %v1232_v3  ;;  %vm2519_vm8 = vcmp.lt.s32.totalorder %v3462_v8, 16 }
  0xb6   :  { %3204 = vmatprep.subr.msk.mxu0 %vm45_vm1, %v1237_v7  ;;  %3207 = vmatprep.subr.msk.mxu1 %vm45_vm1, %v1239_v4 }
  0xb7   :  { %3205 = vmatpush1.msk.msra.mxu0 %vm45_vm1, %v1238_v9  ;;  %3208 = vmatpush1.msk.msra.mxu1 %vm45_vm1, %v1236_v5 }
  0xb8   :  { %v1403_v10 = vpop.permute.xlu1 %1402  ;;  %v1241_v11 = vpop.permute.xlu0 %1240 }
  0xb9   :  { %3206 = vmatmul.mubr.msk.f32.vlgmr.msra.gmra.mrb[0].mxu0 %vm42_vm2, %v1241_v11  ;;  %3209 = vmatmul.mubr.msk.f32.vlgmr.msra.gmra.mrb[0].mxu1 %vm42_vm2, %v1241_v11 }
  0xba   :  { %1495 = vmatprep.mubr.f32.mxu0 %v3331_v2  ;;  %1566 = vmatprep.mubr.f32.mxu1 %v3331_v2 }
  0xbc   :  { %v1407_v12 = vpop.permute.xlu1 %1406  ;;  %v1405_v13 = vpop.permute.xlu0 %1404 }
  0xbd   :  { %v1412_v14 = vsel %vm1410_vm9, %v1405_v13, %v1407_v12  ;;  %v1413_v15 = vsel %vm1410_vm9, %v1403_v10, %v1405_v13 }
  0xbe   :  { %3210 = vmatprep.subr.msk.mxu0 %vm45_vm1, %v1412_v14 }
  0xbf   :  { %3211 = vmatpush1.msk.msra.mxu0 %vm45_vm1, %v1413_v15 }
  0xc0   :  { %v1416_v16 = vpop.permute.xlu1 %1415  ;;  %v1409_v17 = vpop.permute.xlu0 %1408 }
  0xc1   :  { %v1411_v18 = vsel %vm1410_vm9, %v1407_v12, %v1409_v17  ;;  %v1414_v19 = vsel %vm1410_vm9, %v1409_v17, %v1403_v10  ;;  %3212 = vmatmul.mubr.msk.f32.vlgmr.msra.gmra.mrb[0].mxu0 %vm42_vm2, %v1416_v16  ;;  %vm2682_vm9 = vcmp.lt.s32.totalorder %v3462_v8, 2 }
  0xc2   :  { %3213 = vmatprep.subr.msk.mxu1 %vm45_vm1, %v1414_v19  ;;  %1800 = vmatprep.mubr.f32.mxu0 %v3331_v2 }
  0xc3   :  { %3214 = vmatpush1.msk.msra.mxu1 %vm45_vm1, %v1411_v18  ;;  %vm1687_vm1 = vmand %vm3595_vm15, %vm3599_vm0 }
  0xc4   :  { %3215 = vmatmul.mubr.msk.f32.vlgmr.msra.gmra.mrb[0].mxu1 %vm42_vm2, %v1416_v16  ;;  %v1732_v47 = vpop.permute.xlu0 %1731  ;;  %vm1725_vm2 = vcmp.lt.s32.totalorder %v3462_v8, 33 }
  0xc5   :  { %1871 = vmatprep.mubr.f32.mxu1 %v3331_v2 }
 0x194   :  { %v3552_v23 = vpop.f32.mrb[0].mxu0 }
 0x195   :  { %v1688_v25 = vmax.f32 %v3552_v23, 0.0  ;;  %v3559_v26 = vpop.f32.mrb[1].mxu0 }
 0x196   :  { %v1689_v41 = vmax.f32 %v3559_v26, 0.0 }
 0x197   :  { %v1700_v28 = vsel %vm3554_vm10, %v1688_v25, 0.0  ;;  %v3566_v29 = vpop.f32.mrb[0].mxu1 }
 0x198   :  { %v1690_v31 = vmax.f32 %v3566_v29, 0.0  ;;  %1704 = vrot.lane.b32.xlu1 %v1700_v28, %s3346_s2  ;;  %1717 = vrot.lane.b32.xlu0 %v1700_v28, %s3347_s5  ;;  %v3574_v32 = vpop.f32.mrb[1].mxu1  ;;  %v1701_v44 = vsel %vm1685_vm14, %v1689_v41, 0.0 }
 0x199   :  { %v1691_v45 = vmax.f32 %v3574_v32, 0.0 }
 0x19a   :  { %v1702_v36 = vsel %vm3568_vm11, %v1690_v31, 0.0 }
 0x19b   :  { %v1703_v46 = vsel %vm1687_vm1, %v1691_v45, 0.0 }
 0x19c   :  { %1708 = vrot.lane.b32.xlu1 %v1702_v36, %s3346_s2  ;;  %1721 = vrot.lane.b32.xlu0 %v1702_v36, %s3347_s5 }
 0x1a0   :  { %2022 = vrot.lane.b32.xlu1 %v1700_v28, %s3348_s6  ;;  %2185 = vrot.lane.b32.xlu0 %v1700_v28, %s3349_s7 }
 0x1a4   :  { %1719 = vrot.lane.b32.xlu1 %v1701_v44, %s3347_s5  ;;  %2189 = vrot.lane.b32.xlu0 %v1702_v36, %s3349_s7 }
 0x1a8   :  { %1706 = vrot.lane.b32.xlu0 %v1701_v44, %s3346_s2  ;;  %1723 = vrot.lane.b32.xlu1 %v1703_v46, %s3347_s5 }
 0x1ac   :  { %1710 = vrot.lane.b32.xlu0 %v1703_v46, %s3346_s2  ;;  %2026 = vrot.lane.b32.xlu1 %v1702_v36, %s3348_s6 }
 0x1b0   :  { %2024 = vrot.lane.b32.xlu0 %v1701_v44, %s3348_s6  ;;  %2035 = vrot.lane.b32.xlu1 %v3458_v6, %s3336_s21 }
 0x1b4   :  { %2028 = vrot.lane.b32.xlu0 %v1703_v46, %s3348_s6  ;;  %2348 = vrot.lane.b32.xlu1 %v1700_v28, %s3350_s8 }
 0x1b8   :  { %2198 = vrot.lane.b32.xlu0 %v3458_v6, %s3342_s26  ;;  %2352 = vrot.lane.b32.xlu1 %v1702_v36, %s3350_s8 }
 0x1bc   :  { %2511 = vrot.lane.b32.xlu0 %v1700_v28, %s3351_s9  ;;  %2187 = vrot.lane.b32.xlu1 %v1701_v44, %s3349_s7 }
 0x1c0   :  { %2350 = vrot.lane.b32.xlu0 %v1701_v44, %s3350_s8  ;;  %2191 = vrot.lane.b32.xlu1 %v1703_v46, %s3349_s7 }
 0x1c4   :  { %2354 = vrot.lane.b32.xlu0 %v1703_v46, %s3350_s8  ;;  %2361 = vrot.lane.b32.xlu1 %v3458_v6, %s3340_s24 }
 0x1c8   :  { %2515 = vrot.lane.b32.xlu0 %v1702_v36, %s3351_s9  ;;  %2674 = vrot.lane.b32.xlu1 %v1700_v28, %s3352_s10 }
 0x1cc   :  { %2524 = vrot.lane.b32.xlu0 %v3458_v6, %s3353_s11  ;;  %2513 = vrot.lane.b32.xlu1 %v1701_v44, %s3351_s9 }
 0x1d0   :  { %2676 = vrot.lane.b32.xlu0 %v1701_v44, %s3352_s10  ;;  %2517 = vrot.lane.b32.xlu1 %v1703_v46, %s3351_s9 }
 0x1d4   :  { %2680 = vrot.lane.b32.xlu0 %v1703_v46, %s3352_s10  ;;  %2678 = vrot.lane.b32.xlu1 %v1702_v36, %s3352_s10 }
 0x1d8   :  { %2837 = vrot.lane.b32.xlu0 %v1700_v28, %s3354_s12  ;;  %2687 = vrot.lane.b32.xlu1 %v3458_v6, %s3355_s13 }
 0x1dc   :  { %2841 = vrot.lane.b32.xlu0 %v1702_v36, %s3354_s12  ;;  %2839 = vrot.lane.b32.xlu1 %v1701_v44, %s3354_s12 }
 0x1e0   :  { %2843 = vrot.lane.b32.xlu1 %v1703_v46, %s3354_s12  ;;  %2850 = vrot.lane.b32.xlu0 %v3458_v6, %s3356_s14 }
 0x1e4   :  { %3000 = vrot.lane.b32.xlu1 %v3458_v6, %s3357_s15 }
 0x20a   :  { %v1705_v48 = vpop.permute.xlu1 %1704  ;;  %v1718_v49 = vpop.permute.xlu0 %1717 }
 0x20e   :  { %v1709_v50 = vpop.permute.xlu1 %1708  ;;  %v1722_v51 = vpop.permute.xlu0 %1721 }
 0x212   :  { %v2023_v52 = vpop.permute.xlu1 %2022  ;;  %v2186_v53 = vpop.permute.xlu0 %2185 }
 0x216   :  { %v1720_v54 = vpop.permute.xlu1 %1719  ;;  %v2190_v55 = vpop.permute.xlu0 %2189 }
 0x217   :  { %v1728_v56 = vsel %vm1725_vm2, %v1718_v49, %v1720_v54  ;;  %v1727_v62 = vsel %vm1725_vm2, %v1720_v54, %v1722_v51 }
 0x218   :  { %1736 = vmatprep.subr.mxu0 %v1728_v56 }
 0x21a   :  { %v1724_v57 = vpop.permute.xlu1 %1723  ;;  %v1707_v58 = vpop.permute.xlu0 %1706 }
 0x21b   :  { %v1729_v59 = vsel %vm1725_vm2, %v1724_v57, %v1718_v49  ;;  %v1726_v60 = vsel %vm1725_vm2, %v1722_v51, %v1724_v57  ;;  %v1715_v61 = vsel %vm1712_vm3, %v1705_v48, %v1707_v58  ;;  %v1714_v4 = vsel %vm1712_vm3, %v1707_v58, %v1709_v50 }
 0x21c   :  { %1737 = vmatpush1.msra.mxu0 %v1729_v59  ;;  %1807 = vmatprep.subr.mxu1 %v1726_v60  ;;  %vm2845_vm2 = vcmp.lt.s32.totalorder %v3462_v8, 1 }
 0x21d   :  { %3216 = vmatmul.mubr.msk.f32.vlgmr.msra.gmra.mrb[2].mxu0 %vm1733_vm4, %v1732_v47  ;;  %1808 = vmatpush1.msra.mxu1 %v1727_v62 }
 0x21e   :  { %1880 = vmatprep.subr.mxu0 %v1715_v61  ;;  %v2027_v63 = vpop.permute.xlu1 %2026  ;;  %3217 = vmatmul.mubr.msk.f32.vlgmr.msra.gmra.mrb[2].mxu1 %vm1733_vm4, %v1732_v47  ;;  %v1711_v0 = vpop.permute.xlu0 %1710 }
 0x21f   :  { %v1716_v1 = vsel %vm1712_vm3, %v1711_v0, %v1705_v48  ;;  %v1713_v3 = vsel %vm1712_vm3, %v1709_v50, %v1711_v0  ;;  %1944 = vmatprep.mubr.f32.mxu0 %v3331_v2  ;;  %2015 = vmatprep.mubr.f32.mxu1 %v3331_v2 }
 0x220   :  { %1881 = vmatpush1.msra.mxu0 %v1716_v1  ;;  %1951 = vmatprep.subr.mxu1 %v1713_v3 }
 0x221   :  { %1952 = vmatpush1.msra.mxu1 %v1714_v4 }
 0x222   :  { %v2036_v5 = vpop.permute.xlu1 %2035  ;;  %v2025_v7 = vpop.permute.xlu0 %2024 }
 0x223   :  { %v2033_v9 = vsel %vm2030_vm5, %v2023_v52, %v2025_v7  ;;  %v2032_v14 = vsel %vm2030_vm5, %v2025_v7, %v2027_v63 }
 0x224   :  { %2039 = vmatprep.subr.mxu0 %v2033_v9 }
 0x225   :  { %3218 = vmatmul.mubr.msk.f32.vlgmr.msra.gmra.mrb[2].mxu0 %vm1733_vm4, %v3458_v6 }
 0x226   :  { %v2349_v10 = vpop.permute.xlu1 %2348  ;;  %3219 = vmatmul.mubr.msk.f32.vlgmr.msra.gmra.mrb[2].mxu1 %vm1733_vm4, %v3458_v6  ;;  %v2029_v11 = vpop.permute.xlu0 %2028  ;;  %2103 = vmatprep.mubr.f32.mxu0 %v3331_v2 }
 0x227   :  { %v2034_v12 = vsel %vm2030_vm5, %v2029_v11, %v2023_v52  ;;  %v2031_v13 = vsel %vm2030_vm5, %v2027_v63, %v2029_v11  ;;  %2174 = vmatprep.mubr.f32.mxu1 %v3331_v2 }
 0x228   :  { %2040 = vmatpush1.msra.mxu0 %v2034_v12  ;;  %2110 = vmatprep.subr.mxu1 %v2031_v13 }
 0x229   :  { %2111 = vmatpush1.msra.mxu1 %v2032_v14 }
 0x22a   :  { %v2353_v15 = vpop.permute.xlu1 %2352  ;;  %v2199_v16 = vpop.permute.xlu0 %2198 }
 0x22d   :  { %3220 = vmatmul.mubr.msk.f32.vlgmr.msra.gmra.mrb[2].mxu0 %vm1733_vm4, %v2036_v5 }
 0x22e   :  { %v2188_v17 = vpop.permute.xlu1 %2187  ;;  %3221 = vmatmul.mubr.msk.f32.vlgmr.msra.gmra.mrb[2].mxu1 %vm1733_vm4, %v2036_v5  ;;  %v2512_v6 = vpop.permute.xlu0 %2511  ;;  %2266 = vmatprep.mubr.f32.mxu0 %v3331_v2 }
 0x22f   :  { %v2196_v18 = vsel %vm2193_vm6, %v2186_v53, %v2188_v17  ;;  %2337 = vmatprep.mubr.f32.mxu1 %v3331_v2  ;;  %v2195_v28 = vsel %vm2193_vm6, %v2188_v17, %v2190_v55 }
 0x230   :  { %2202 = vmatprep.subr.mxu0 %v2196_v18 }
 0x232   :  { %v2192_v19 = vpop.permute.xlu1 %2191  ;;  %v2351_v20 = vpop.permute.xlu0 %2350 }
 0x233   :  { %v2197_v21 = vsel %vm2193_vm6, %v2192_v19, %v2186_v53  ;;  %v2194_v22 = vsel %vm2193_vm6, %v2190_v55, %v2192_v19  ;;  %v2359_v27 = vsel %vm2356_vm7, %v2349_v10, %v2351_v20  ;;  %v2358_v39 = vsel %vm2356_vm7, %v2351_v20, %v2353_v15 }
 0x234   :  { %2203 = vmatpush1.msra.mxu0 %v2197_v21  ;;  %2273 = vmatprep.subr.mxu1 %v2194_v22 }
 0x235   :  { %3222 = vmatmul.mubr.msk.f32.vlgmr.msra.gmra.mrb[2].mxu0 %vm1733_vm4, %v2199_v16  ;;  %2274 = vmatpush1.msra.mxu1 %v2195_v28 }
 0x236   :  { %2365 = vmatprep.subr.mxu0 %v2359_v27  ;;  %v2362_v33 = vpop.permute.xlu1 %2361  ;;  %3223 = vmatmul.mubr.msk.f32.vlgmr.msra.gmra.mrb[2].mxu1 %vm1733_vm4, %v2199_v16  ;;  %v2355_v34 = vpop.permute.xlu0 %2354 }
 0x237   :  { %v2360_v35 = vsel %vm2356_vm7, %v2355_v34, %v2349_v10  ;;  %v2357_v36 = vsel %vm2356_vm7, %v2353_v15, %v2355_v34  ;;  %2429 = vmatprep.mubr.f32.mxu0 %v3331_v2  ;;  %2500 = vmatprep.mubr.f32.mxu1 %v3331_v2 }
 0x238   :  { %2366 = vmatpush1.msra.mxu0 %v2360_v35  ;;  %2436 = vmatprep.subr.mxu1 %v2357_v36 }
 0x239   :  { %2437 = vmatpush1.msra.mxu1 %v2358_v39 }
 0x23a   :  { %v2675_v40 = vpop.permute.xlu1 %2674  ;;  %v2516_v44 = vpop.permute.xlu0 %2515 }
 0x23d   :  { %3224 = vmatmul.mubr.msk.f32.vlgmr.msra.gmra.mrb[2].mxu0 %vm1733_vm4, %v2362_v33 }
 0x23e   :  { %v2514_v46 = vpop.permute.xlu1 %2513  ;;  %3225 = vmatmul.mubr.msk.f32.vlgmr.msra.gmra.mrb[2].mxu1 %vm1733_vm4, %v2362_v33  ;;  %v2525_v47 = vpop.permute.xlu0 %2524  ;;  %2592 = vmatprep.mubr.f32.mxu0 %v3331_v2 }
 0x23f   :  { %v2522_v48 = vsel %vm2519_vm8, %v2512_v6, %v2514_v46  ;;  %2663 = vmatprep.mubr.f32.mxu1 %v3331_v2  ;;  %v2521_v54 = vsel %vm2519_vm8, %v2514_v46, %v2516_v44 }
 0x240   :  { %2528 = vmatprep.subr.mxu0 %v2522_v48 }
 0x242   :  { %v2518_v49 = vpop.permute.xlu1 %2517  ;;  %v2677_v50 = vpop.permute.xlu0 %2676 }
 0x243   :  { %v2523_v51 = vsel %vm2519_vm8, %v2518_v49, %v2512_v6  ;;  %v2520_v52 = vsel %vm2519_vm8, %v2516_v44, %v2518_v49  ;;  %v2685_v53 = vsel %vm2682_vm9, %v2675_v40, %v2677_v50 }
 0x244   :  { %2529 = vmatpush1.msra.mxu0 %v2523_v51  ;;  %2599 = vmatprep.subr.mxu1 %v2520_v52 }
 0x245   :  { %3226 = vmatmul.mubr.msk.f32.vlgmr.msra.gmra.mrb[2].mxu0 %vm1733_vm4, %v2525_v47  ;;  %2600 = vmatpush1.msra.mxu1 %v2521_v54 }
 0x246   :  { %2691 = vmatprep.subr.mxu0 %v2685_v53  ;;  %v2679_v55 = vpop.permute.xlu1 %2678  ;;  %3227 = vmatmul.mubr.msk.f32.vlgmr.msra.gmra.mrb[2].mxu1 %vm1733_vm4, %v2525_v47  ;;  %v2681_v56 = vpop.permute.xlu0 %2680 }
 0x247   :  { %v2684_v57 = vsel %vm2682_vm9, %v2677_v50, %v2679_v55  ;;  %v2686_v58 = vsel %vm2682_vm9, %v2681_v56, %v2675_v40  ;;  %v2683_v59 = vsel %vm2682_vm9, %v2679_v55, %v2681_v56  ;;  %2755 = vmatprep.mubr.f32.mxu0 %v3331_v2  ;;  %2826 = vmatprep.mubr.f32.mxu1 %v3331_v2 }
 0x248   :  { %2692 = vmatpush1.msra.mxu0 %v2686_v58  ;;  %2762 = vmatprep.subr.mxu1 %v2683_v59 }
 0x249   :  { %2763 = vmatpush1.msra.mxu1 %v2684_v57 }
 0x24a   :  { %v2688_v60 = vpop.permute.xlu1 %2687  ;;  %v2838_v61 = vpop.permute.xlu0 %2837 }
 0x24d   :  { %3228 = vmatmul.mubr.msk.f32.vlgmr.msra.gmra.mrb[2].mxu0 %vm1733_vm4, %v2688_v60 }
 0x24e   :  { %v2840_v62 = vpop.permute.xlu1 %2839  ;;  %3229 = vmatmul.mubr.msk.f32.vlgmr.msra.gmra.mrb[2].mxu1 %vm1733_vm4, %v2688_v60  ;;  %v2842_v63 = vpop.permute.xlu0 %2841  ;;  %2918 = vmatprep.mubr.f32.mxu0 %v3331_v2 }
 0x24f   :  { %v2848_v0 = vsel %vm2845_vm2, %v2838_v61, %v2840_v62  ;;  %2989 = vmatprep.mubr.f32.mxu1 %v3331_v2  ;;  %v2847_v7 = vsel %vm2845_vm2, %v2840_v62, %v2842_v63 }
 0x250   :  { %2854 = vmatprep.subr.mxu0 %v2848_v0 }
 0x252   :  { %v2844_v1 = vpop.permute.xlu1 %2843  ;;  %v2851_v3 = vpop.permute.xlu0 %2850 }
 0x253   :  { %v2849_v4 = vsel %vm2845_vm2, %v2844_v1, %v2838_v61  ;;  %v2846_v5 = vsel %vm2845_vm2, %v2842_v63, %v2844_v1 }
 0x254   :  { %2855 = vmatpush1.msra.mxu0 %v2849_v4  ;;  %2925 = vmatprep.subr.mxu1 %v2846_v5 }
 0x255   :  { %3230 = vmatmul.mubr.msk.f32.vlgmr.msra.gmra.mrb[2].mxu0 %vm1733_vm4, %v2851_v3  ;;  %2926 = vmatpush1.msra.mxu1 %v2847_v7 }
 0x256   :  { %3232 = vmatprep.subr.msk.mxu0 %vm1685_vm14, %v1689_v41  ;;  %3231 = vmatmul.mubr.msk.f32.vlgmr.msra.gmra.mrb[2].mxu1 %vm1733_vm4, %v2851_v3  ;;  %v3001_v8 = vpop.permute.xlu1 %3000 }
 0x257   :  { %3233 = vmatpush1.msk.msra.mxu0 %vm3554_vm10, %v1688_v25  ;;  %3235 = vmatprep.subr.msk.mxu1 %vm1687_vm1, %v1691_v45 }
 0x258   :  { %3236 = vmatpush1.msk.msra.mxu1 %vm3568_vm11, %v1690_v31  ;;  %3068 = vmatprep.mubr.f32.mxu0 %v3331_v2 }
 0x259   :  { %3139 = vmatprep.mubr.f32.mxu1 %v3331_v2 }
 0x25d   :  { %3234 = vmatmul.mubr.msk.f32.vlgmr.msra.gmra.mrb[2].mxu0 %vm1733_vm4, %v3001_v8 }
 0x25e   :  { %3237 = vmatmul.mubr.msk.f32.vlgmr.msra.gmra.mrb[2].mxu1 %vm1733_vm4, %v3001_v8 }
 0x330   :  { %v3070_v23 = vpop.f32.mrb[2].mxu0 }
 0x331   :  { %v3150_v24 = vmax.f32 %v3070_v23, 0.0  ;;  %v3072_v25 = vpop.f32.mrb[3].mxu0  ;;  %v3141_v26 = vpop.f32.mrb[2].mxu1 }
 0x332   :  { %v3151_v32 = vmax.f32 %v3072_v25, 0.0  ;;  %v3152_v37 = vmax.f32 %v3141_v26, 0.0  ;;  %v3143_v38 = vpop.f32.mrb[3].mxu1 }
 0x333   :  { %3154 = vst [vmem:[%s3739_s3] sm:$0xff] %v3150_v24  ;;  %v3153_v29 = vmax.f32 %v3143_v38, 0.0 }
 0x334   :  { %3155 = vst [vmem:[%s3739_s3 + $0x8] sm:$0xff] %v3151_v32  ;;  %3156 = vst [vmem:[%s3739_s3 + $0x10] sm:$0xff] %v3152_v37 }
 0x335   :  { %3157 = vst [vmem:[%s3739_s3 + $0x18] sm:$0xff] %v3153_v29 }

</bundles_post_ra>
